<compile_context>
chip_gen: v5e
topology: v5e:2x2
jax: 0.10.0
libtpu: 0.0.40
codegen_flags: <defaults>
</compile_context>

<pallas_src>
import functools

import jax
import jax.numpy as jnp
from jax.experimental import pallas as pl
from jax.experimental.pallas import tpu as pltpu


def ffn_kernel(x_ref, wup_ref, bup_ref, wdown_ref, bdown_ref, o_ref, acc_ref):
    k = pl.program_id(1)

    @pl.when(k == 0)
    def _init():
        acc_ref[...] = jnp.zeros_like(acc_ref)

    # Up-projection for this I-chunk: (tm, H)bf16 @ (H, ti)bf16 -> (tm, ti)f32
    h = jnp.dot(x_ref[...], wup_ref[...], preferred_element_type=jnp.float32)
    h = jnp.maximum(h + bup_ref[...], 0.0)            # bias + ReLU in f32 (VPU)

    # Down-projection partial sum: (tm, ti)bf16 @ (ti, H)bf16 -> (tm, H)f32
    acc_ref[...] += jnp.dot(h.astype(wdown_ref.dtype), wdown_ref[...],
                            preferred_element_type=jnp.float32)

    @pl.when(k == pl.num_programs(1) - 1)
    def _finalize():
        # Output bias added exactly once per M-tile, then cast to output dtype.
        # TODO(synk): training-mode dropout (random mask + 1/(1-p) rescale) not
        # implemented; inference-mode dropout is the identity.
        o_ref[...] = (acc_ref[...] + bdown_ref[...]).astype(o_ref.dtype)


def _round_up(n, m):
    return ((n + m - 1) // m) * m


def bert_feed_forward(x, w_up, b_up, w_down, b_down, *,
                      tm=512, ti=512, compute_dtype=jnp.bfloat16):
    """x: [B, S, H]; w_up: [H, I]; w_down: [I, H]; returns [B, S, H]."""
    B, S, H = x.shape
    Hw, I = w_up.shape
    assert Hw == H and w_down.shape == (I, H)
    M = B * S

    # Clamp the token tile to the (sublane-aligned) problem size; pad M up to
    # a tile multiple instead of asserting divisibility.
    tm_eff = min(tm, _round_up(M, 8))
    M_pad = _round_up(M, tm_eff)

    # Clamp the intermediate chunk; fall back to the full width if it does not
    # divide I evenly (keeps the (8,128) BlockSpec rule satisfied).
    ti_eff = min(ti, I)
    if I % ti_eff != 0:
        ti_eff = I

    out_dtype = x.dtype

    x2d = x.reshape(M, H).astype(compute_dtype)
    if M_pad != M:
        x2d = jnp.pad(x2d, ((0, M_pad - M), (0, 0)))

    w_up_c = w_up.astype(compute_dtype)
    w_down_c = w_down.astype(compute_dtype)
    b_up2d = b_up.reshape(1, I).astype(jnp.float32)
    b_down2d = b_down.reshape(1, H).astype(jnp.float32)

    # Rough double-buffered VMEM footprint -> explicit scoped-VMEM limit
    # (kept well under v7x's 64 MiB physical VMEM).
    in_b = jnp.dtype(compute_dtype).itemsize
    out_b = jnp.dtype(out_dtype).itemsize
    footprint = (
        2 * tm_eff * H * in_b          # X tiles (double buffered)
        + 2 * H * ti_eff * in_b        # W_up chunks
        + 2 * ti_eff * 4               # b_up chunks
        + 2 * ti_eff * H * in_b        # W_down chunks
        + 2 * H * 4                    # b_down
        + 2 * tm_eff * H * out_b       # output tiles
        + tm_eff * H * 4               # f32 accumulator scratch
        + tm_eff * ti_eff * 4          # live ReLU intermediate
    )
    vmem_limit = min(48 * 1024 * 1024,
                     max(32 * 1024 * 1024, int(1.5 * footprint)))

    grid = (M_pad // tm_eff, I // ti_eff)

    out2d = pl.pallas_call(
        ffn_kernel,
        out_shape=jax.ShapeDtypeStruct((M_pad, H), out_dtype),
        grid_spec=pltpu.PrefetchScalarGridSpec(
            num_scalar_prefetch=0,
            grid=grid,
            in_specs=[
                pl.BlockSpec((tm_eff, H), lambda i, k: (i, 0)),   # X tile
                pl.BlockSpec((H, ti_eff), lambda i, k: (0, k)),   # W_up chunk
                pl.BlockSpec((1, ti_eff), lambda i, k: (0, k)),   # b_up chunk
                pl.BlockSpec((ti_eff, H), lambda i, k: (k, 0)),   # W_down chunk
                pl.BlockSpec((1, H), lambda i, k: (0, 0)),        # b_down
            ],
            out_specs=pl.BlockSpec((tm_eff, H), lambda i, k: (i, 0)),
            scratch_shapes=[pltpu.VMEM((tm_eff, H), jnp.float32)],
        ),
        compiler_params=pltpu.CompilerParams(
            dimension_semantics=("parallel", "arbitrary"),
            vmem_limit_bytes=vmem_limit,
        ),
    )(x2d, w_up_c, b_up2d, w_down_c, b_down2d)

    return out2d[:M].reshape(B, S, H)


def _reference(x, w_up, b_up, w_down, b_down):
    return jnp.maximum(x @ w_up + b_up, 0.0) @ w_down + b_down


if __name__ == "__main__":
    # BertConfig-like small shapes.
    batch, seq = 2, 8
    hidden_size = 32
    intermediate_size = 128

    key = jax.random.PRNGKey(0)
    kx, k1, k2, k3, k4, kx2 = jax.random.split(key, 6)

    x = jax.random.normal(kx, (batch, seq, hidden_size), dtype=jnp.float32)

    # Deterministic parameter init (synthetic; not a checkpoint load).
    # Stored pre-transposed: w_up [H, I], w_down [I, H].
    w_up = jax.random.normal(k1, (hidden_size, intermediate_size), jnp.float32) * 0.02
    b_up = jax.random.normal(k2, (intermediate_size,), jnp.float32) * 0.02
    w_down = jax.random.normal(k3, (intermediate_size, hidden_size), jnp.float32) * 0.02
    b_down = jax.random.normal(k4, (hidden_size,), jnp.float32) * 0.02

    out = bert_feed_forward(x, w_up, b_up, w_down, b_down)
    out = jax.block_until_ready(out)

    ref = _reference(x, w_up, b_up, w_down, b_down)
    assert out.shape == (batch, seq, hidden_size)
    # bf16 MXU inputs with f32 accumulation -> loose tolerance vs f32 reference.
    assert jnp.allclose(out, ref, atol=1e-2, rtol=1e-2), \
        float(jnp.max(jnp.abs(out - ref)))

    # Second case with a token count that is not a multiple of the tile
    # (exercises the M-padding path).
    x2 = jax.random.normal(kx2, (3, 5, hidden_size), dtype=jnp.float32)
    out2 = bert_feed_forward(x2, w_up, b_up, w_down, b_down)
    out2 = jax.block_until_ready(out2)
    ref2 = _reference(x2, w_up, b_up, w_down, b_down)
    assert out2.shape == (3, 5, hidden_size)
    assert jnp.allclose(out2, ref2, atol=1e-2, rtol=1e-2), \
        float(jnp.max(jnp.abs(out2 - ref2)))

    print("KERNEL_OK")
</pallas_src>

<mosaic_0001>
module attributes {stable_mosaic.version = 11 : i64} {
  func.func @ffn_kernel(%arg0: i32, %arg1: i32, %arg2: memref<16x32xbf16, #tpu.memory_space<vmem>>, %arg3: memref<32x128xbf16, #tpu.memory_space<vmem>>, %arg4: memref<1x128xf32, #tpu.memory_space<vmem>>, %arg5: memref<128x32xbf16, #tpu.memory_space<vmem>>, %arg6: memref<1x32xf32, #tpu.memory_space<vmem>>, %arg7: memref<16x32xf32, #tpu.memory_space<vmem>>, %arg8: memref<16x32xf32, #tpu.memory_space<vmem>>) attributes {dimension_semantics = [#tpu.dimension_semantics<parallel>, #tpu.dimension_semantics<arbitrary>], iteration_bounds = array<i64: 1, 1>, scalar_prefetch = 0 : i64, scratch_operands = 1 : i64, tpu.core_type = #tpu.core_type<tc>, window_params = [{transform_indices = @transform_0, window_bounds = array<i64: 16, 32>}, {transform_indices = @transform_1, window_bounds = array<i64: 32, 128>}, {transform_indices = @transform_2, window_bounds = array<i64: 1, 128>}, {transform_indices = @transform_3, window_bounds = array<i64: 128, 32>}, {pipeline_mode = #tpu.pipeline_mode<synchronous>, transform_indices = @transform_4, window_bounds = array<i64: 1, 32>}, {transform_indices = @transform_5, window_bounds = array<i64: 16, 32>}]} {
    %c0_i32 = arith.constant 0 : i32
    %0 = arith.cmpi eq, %arg1, %c0_i32 : i32
    %1 = arith.extui %0 : i1 to i32
    %c0_i32_0 = arith.constant 0 : i32
    %2 = arith.cmpi ne, %1, %c0_i32_0 : i32
    scf.if %2 {
      %cst_16 = arith.constant 0.000000e+00 : f32
      %20 = vector.broadcast %cst_16 : f32 to vector<16x32xf32>
      %c0_17 = arith.constant 0 : index
      %c0_18 = arith.constant 0 : index
      %21 = vector.load %arg8[%c0_17, %c0_18] : memref<16x32xf32, #tpu.memory_space<vmem>>, vector<16x32xf32>
      tpu.vector_store %arg8[%c0_17, %c0_18], %20 {strides = array<i32>} : memref<16x32xf32, #tpu.memory_space<vmem>>, vector<16x32xf32>,
    } else {
    }
    %c0 = arith.constant 0 : index
    %c0_1 = arith.constant 0 : index
    %3 = vector.load %arg2[%c0, %c0_1] : memref<16x32xbf16, #tpu.memory_space<vmem>>, vector<16x32xbf16>
    %c0_2 = arith.constant 0 : index
    %c0_3 = arith.constant 0 : index
    %4 = vector.load %arg3[%c0_2, %c0_3] : memref<32x128xbf16, #tpu.memory_space<vmem>>, vector<32x128xbf16>
    %cst = arith.constant dense<0.000000e+00> : vector<16x128xf32>
    %5 = tpu.matmul %3, %4, %cst {dimension_numbers = #tpu.dot_dimension_numbers<[1], [0], [0], [1], [0, 0, 1, 1], [], []>} : vector<16x32xbf16>, vector<32x128xbf16>, vector<16x128xf32> -> vector<16x128xf32>
    %c0_4 = arith.constant 0 : index
    %c0_5 = arith.constant 0 : index
    %6 = vector.load %arg4[%c0_4, %c0_5] : memref<1x128xf32, #tpu.memory_space<vmem>>, vector<1x128xf32>
    %7 = vector.broadcast %6 : vector<1x128xf32> to vector<16x128xf32>
    %8 = arith.addf %5, %7 : vector<16x128xf32>
    %cst_6 = arith.constant 0.000000e+00 : f32
    %9 = vector.broadcast %cst_6 : f32 to vector<16x128xf32>
    %10 = arith.maximumf %8, %9 : vector<16x128xf32>
    %c0_7 = arith.constant 0 : index
    %c0_8 = arith.constant 0 : index
    %11 = vector.load %arg8[%c0_7, %c0_8] : memref<16x32xf32, #tpu.memory_space<vmem>>, vector<16x32xf32>
    %12 = arith.truncf %10 : vector<16x128xf32> to vector<16x128xbf16>
    %c0_9 = arith.constant 0 : index
    %c0_10 = arith.constant 0 : index
    %13 = vector.load %arg5[%c0_9, %c0_10] : memref<128x32xbf16, #tpu.memory_space<vmem>>, vector<128x32xbf16>
    %cst_11 = arith.constant dense<0.000000e+00> : vector<16x32xf32>
    %14 = tpu.matmul %12, %13, %cst_11 {dimension_numbers = #tpu.dot_dimension_numbers<[1], [0], [0], [1], [0, 0, 1, 1], [], []>} : vector<16x128xbf16>, vector<128x32xbf16>, vector<16x32xf32> -> vector<16x32xf32>
    %15 = arith.addf %11, %14 : vector<16x32xf32>
    %c0_12 = arith.constant 0 : index
    %c0_13 = arith.constant 0 : index
    %16 = vector.load %arg8[%c0_12, %c0_13] : memref<16x32xf32, #tpu.memory_space<vmem>>, vector<16x32xf32>
    tpu.vector_store %arg8[%c0_12, %c0_13], %15 {strides = array<i32>} : memref<16x32xf32, #tpu.memory_space<vmem>>, vector<16x32xf32>,
    %c0_i32_14 = arith.constant 0 : i32
    %17 = arith.cmpi eq, %arg1, %c0_i32_14 : i32
    %18 = arith.extui %17 : i1 to i32
    %c0_i32_15 = arith.constant 0 : i32
    %19 = arith.cmpi ne, %18, %c0_i32_15 : i32
    scf.if %19 {
      %c0_16 = arith.constant 0 : index
      %c0_17 = arith.constant 0 : index
      %20 = vector.load %arg8[%c0_16, %c0_17] : memref<16x32xf32, #tpu.memory_space<vmem>>, vector<16x32xf32>
      %c0_18 = arith.constant 0 : index
      %c0_19 = arith.constant 0 : index
      %21 = vector.load %arg6[%c0_18, %c0_19] : memref<1x32xf32, #tpu.memory_space<vmem>>, vector<1x32xf32>
      %22 = vector.broadcast %21 : vector<1x32xf32> to vector<16x32xf32>
      %23 = arith.addf %20, %22 : vector<16x32xf32>
      %c0_20 = arith.constant 0 : index
      %c0_21 = arith.constant 0 : index
      %24 = vector.load %arg7[%c0_20, %c0_21] : memref<16x32xf32, #tpu.memory_space<vmem>>, vector<16x32xf32>
      tpu.vector_store %arg7[%c0_20, %c0_21], %23 {strides = array<i32>} : memref<16x32xf32, #tpu.memory_space<vmem>>, vector<16x32xf32>,
    } else {
    }
    return
  }
  func.func @transform_0(%arg0: i32, %arg1: i32) -> (i32, i32) {
    %c0_i32 = arith.constant 0 : i32
    %c0_i32_0 = arith.constant 0 : i32
    return %arg0, %c0_i32 : i32, i32
  }
  func.func @transform_1(%arg0: i32, %arg1: i32) -> (i32, i32) {
    %c0_i32 = arith.constant 0 : i32
    %c0_i32_0 = arith.constant 0 : i32
    return %c0_i32, %arg1 : i32, i32
  }
  func.func @transform_2(%arg0: i32, %arg1: i32) -> (i32, i32) {
    %c0_i32 = arith.constant 0 : i32
    %c0_i32_0 = arith.constant 0 : i32
    return %c0_i32, %arg1 : i32, i32
  }
  func.func @transform_3(%arg0: i32, %arg1: i32) -> (i32, i32) {
    %c0_i32 = arith.constant 0 : i32
    %c0_i32_0 = arith.constant 0 : i32
    return %arg1, %c0_i32 : i32, i32
  }
  func.func @transform_4(%arg0: i32, %arg1: i32) -> (i32, i32) {
    %c0_i32 = arith.constant 0 : i32
    %c0_i32_0 = arith.constant 0 : i32
    %c0_i32_1 = arith.constant 0 : i32
    return %c0_i32, %c0_i32_0 : i32, i32
  }
  func.func @transform_5(%arg0: i32, %arg1: i32) -> (i32, i32) {
    %c0_i32 = arith.constant 0 : i32
    %c0_i32_0 = arith.constant 0 : i32
    return %arg0, %c0_i32 : i32, i32
  }
}

</mosaic_0001>

<bundles_post_ra>
// kernel: tpu_custom_call.1
= control target key start
LH: loop header
LB: loop body
LE: loop exit
PB: predicated region body
PF: predicated region fallthrough
CT: control target
= control target key end

     0   :  { %s363_s0 = inlined_call_operand.vmem [shape: bf16[16,32], index: 0, kind: input, shape index: {}]   ;;  %s364_s1 = inlined_call_operand.vmem [shape: bf16[32,128], index: 1, kind: input, shape index: {}]   ;;  %s365_s2 = inlined_call_operand.vmem [shape: f32[1,128], index: 2, kind: input, shape index: {}]   ;;  %s366_s3 = inlined_call_operand.vmem [shape: bf16[128,32], index: 3, kind: input, shape index: {}]   ;;  %s367_s4 = inlined_call_operand.vmem [shape: f32[1,32], index: 4, kind: input, shape index: {}]   ;;  %s368_s5 = inlined_call_operand.hbm [shape: f32[16,32], index: 5, kind: output, shape index: {}]  }
   0x1   :  { %v239_v0 = vld [vmem:[%s364_s1 + $0x8] sm:$0xff]  ;;  %v247_v1 = vld [vmem:[%s366_s3 + $0x38] sm:$0xff]  ;;  %v238_v2 = vld [vmem:[%s364_s1] sm:$0xff] }
   0x2   :  { %66 = vmatpush.bf16.msra.mxu0 %v239_v0  ;;  %143 = vmatpush.bf16.msra.mxu1 %v247_v1  ;;  %v246_v3 = vld [vmem:[%s366_s3 + $0x30] sm:$0xff] }
   0x3   :  { %10 = vsyncpa [#allocation4], 0  ;;  %v237_v4 = vld [vmem:[%s363_s0] sm:$0xff]  ;;  %vm26_vm0 = vcmask 261120   ;;  %v245_v5 = vld [vmem:[%s366_s3 + $0x28] sm:$0xff]  ;;  %v280_v11 = vmov 0.0  }
   0x4   :  { %v244_v6 = vld [vmem:[%s366_s3 + $0x20] sm:$0xff]  ;;  %v243_v7 = vld [vmem:[%s366_s3 + $0x18] sm:$0xff]  ;;  %v242_v8 = vld [vmem:[%s366_s3 + $0x10] sm:$0xff]  ;;  %27 = vst.msk [vmem:[#allocation2] sm:$0xff] %vm26_vm0, %v280_v11  ;;  %s180_s19 = sshll.u32 %s368_s5, 4  ;;  %s283_s20 = smov 8   ;;  %s181_s19 = int_to_ptr.hbm [resolvable:$true] %s180_s19 }
   0x5   :  { %v241_v9 = vld [vmem:[%s366_s3 + $0x8] sm:$0xff]  ;;  %v240_v10 = vld [vmem:[%s366_s3] sm:$0xff]  ;;  %28 = vst.msk [vmem:[#allocation2 + $0x8] sm:$0xff] %vm26_vm0, %v280_v11 }
   0x6   :  { %67 = vmatpush.bf16.msra.mxu0 %v238_v2  ;;  %144 = vmatpush.bf16.msra.mxu1 %v246_v3  ;;  %v252_v13 = vld [vmem:[%s365_s2] ss:$0 sm:$0xff]  ;;  %s281_s2 = smov [#allocation3]  }
   0x7   :  { %v253_v24 = vld [vmem:[%s367_s4] ss:$0 sm:$0xff]  ;;  %s178_s16 = sshll.u32 %s281_s2, 4  ;;  %s282_s4 = smov 128   ;;  %s179_s16 = int_to_ptr.vmem [resolvable:$true] %s178_s16 }
   0x9   :  { %204 = vmatmul.msk.bf16.vlgmr.msra.gmra.mxu0 %vm26_vm0, %v237_v4 }
   0xa   :  { %145 = vmatpush.bf16.msra.mxu1 %v245_v5 }
   0xb   :  { %v76_v20 = vld [vmem:[#allocation2] sm:$0xff] }
   0xc   :  { %v77_v23 = vld [vmem:[#allocation2 + $0x8] sm:$0xff] }
   0xe   :  { %146 = vmatpush.bf16.msra.mxu1 %v244_v6 }
  0x12   :  { %147 = vmatpush.bf16.msra.mxu1 %v243_v7 }
  0x16   :  { %148 = vmatpush.bf16.msra.mxu1 %v242_v8 }
  0x1a   :  { %149 = vmatpush.bf16.msra.mxu1 %v241_v9 }
  0x1e   :  { %150 = vmatpush.bf16.msra.mxu1 %v240_v10 }
  0x86   :  { %v69_v12 = vpop.f32.mrf.mxu0 }
  0x87   :  { %v70_v14 = vadd.f32 %v252_v13, %v69_v12 }
  0x89   :  { %v74_v17 = vmax.f32 %v70_v14, 0.0 }
  0x8e   :  { %v71_v15 = vpop.f32.mrf.mxu0 }
  0x8f   :  { %v72_v16 = vadd.f32 %v252_v13, %v71_v15 }
  0x91   :  { %v75_v18 = vmax.f32 %v72_v16, 0.0 }
  0x93   :  { %v78_v19 = vpack.c.bf16 %v75_v18, %v74_v17 }
  0x95   :  { %151 = vmatmul.bf16.vlgmr.msra.gmra.mxu1 %v78_v19 }
 0x112   :  { %v152_v21 = vpop.f32.mrf.mxu1 }
 0x113   :  { %v157_v22 = vadd.f32 %v152_v21, %v76_v20 }
 0x115   :  { %159 = vst.msk [vmem:[#allocation2] sm:$0xff] %vm26_vm0, %v157_v22 }
 0x11a   :  { %v154_v25 = vpop.f32.mrf.mxu1 }
 0x11b   :  { %v158_v26 = vadd.f32 %v154_v25, %v77_v23 }
 0x11c   :  { %v164_v27 = vld [vmem:[#allocation2] sm:$0xff] }
 0x11d   :  { %160 = vst.msk [vmem:[#allocation2 + $0x8] sm:$0xff] %vm26_vm0, %v158_v26  ;;  %v170_v28 = vadd.f32 %v253_v24, %v164_v27 }
 0x11f   :  { %172 = vst.msk [vmem:[#allocation3] sm:$0xff] %vm26_vm0, %v170_v28 }
 0x124   :  { %v165_v29 = vld [vmem:[#allocation2 + $0x8] sm:$0xff] }
 0x125   :  { %v171_v30 = vadd.f32 %v253_v24, %v165_v29 }
 0x127   :  { %173 = vst.msk [vmem:[#allocation3 + $0x8] sm:$0xff] %vm26_vm0, %v171_v30 }
 0x128   :  { %186 = dma.vmem_to_hbm [thread:$0]  %s179_s16, 256, %s181_s19, [#allocation4], %s282_s4, %s282_s4, %s283_s20  }
 0x129   :  { %278 = dma.done.wait [#allocation4], 256  }
 0x12a   :  { %279 = vsyncadd [#allocation4], 4294967040 }
 0x12b   :  { %191 = vsyncpa [#allocation4], 1 }

</bundles_post_ra>
